<compile_context>
chip_gen: v5e
topology: v5e:2x2
jax: 0.10.0
libtpu: 0.0.40
codegen_flags: <defaults>
</compile_context>

<pallas_src>
import jax
import jax.numpy as jnp
from jax.experimental import pallas as pl
from jax.experimental.pallas import tpu as pltpu

NEG_SLOPE = 0.01  # torch.nn.LeakyReLU default


def _leaky_relu(x):
    return jnp.where(x >= 0, x, NEG_SLOPE * x)


def qtable_kernel(x_ref, w1_ref, b1_ref, w2_ref, b2_ref, w3_ref, b3_ref, o_ref):
    # Transposed (batch-on-lanes) 3-layer MLP for one batch tile:
    #   x_ref : (12, TB)   activations, lane-dense
    #   wN    : (out, in)  PyTorch layout, VMEM-resident across the grid
    #   bN    : (out, 1)   f32, broadcast over lanes
    #   o_ref : (2, TB)    lane-dense output store
    x = x_ref[...]  # compute dtype (bf16 or f32)

    h1 = jnp.dot(w1_ref[...], x, preferred_element_type=jnp.float32) + b1_ref[...]
    h1 = _leaky_relu(h1)  # f32 elementwise

    h2 = jnp.dot(w2_ref[...], h1.astype(w2_ref.dtype),
                 preferred_element_type=jnp.float32) + b2_ref[...]
    h2 = _leaky_relu(h2)

    h3 = jnp.dot(w3_ref[...], h2.astype(w3_ref.dtype),
                 preferred_element_type=jnp.float32) + b3_ref[...]
    o_ref[...] = h3.astype(o_ref.dtype)


def _round_up(n, m):
    return ((n + m - 1) // m) * m


def _dimension_semantics():
    """CORE_PARALLEL on v7x (2 TCs/chip); plain 'parallel' elsewhere."""
    try:
        kind = jax.devices()[0].device_kind.lower()
    except Exception:
        kind = ""
    if "v7" in kind:
        return (pltpu.CORE_PARALLEL,)
    return ("parallel",)


def _cast_params(params, compute_dtype):
    w1, b1, w2, b2, w3, b3 = params
    return (w1.astype(compute_dtype), b1.astype(jnp.float32),
            w2.astype(compute_dtype), b2.astype(jnp.float32),
            w3.astype(compute_dtype), b3.astype(jnp.float32))


def _run_mlp(xT, params_c, Bp, tb, vmem_limit_bytes):
    """xT: (12, Bp) in compute dtype, Bp % tb == 0.  Returns (2, Bp) f32."""
    w1, b1, w2, b2, w3, b3 = params_c
    grid_n = Bp // tb

    flops = 2 * Bp * (12 * 64 + 64 * 32 + 32 * 2)
    bytes_accessed = (
        int(xT.size) * xT.dtype.itemsize
        + 2 * Bp * 4
        + sum(int(a.size) * a.dtype.itemsize for a in params_c))

    return pl.pallas_call(
        qtable_kernel,
        out_shape=jax.ShapeDtypeStruct((2, Bp), jnp.float32),
        grid=(grid_n,),
        in_specs=[
            # activations: one lane-dense batch tile per grid step
            pl.BlockSpec((12, tb), lambda i: (0, i)),
            # weights / biases: full-array blocks, constant index map -> resident
            pl.BlockSpec(w1.shape, lambda i: (0, 0)),
            pl.BlockSpec(b1.shape, lambda i: (0, 0)),
            pl.BlockSpec(w2.shape, lambda i: (0, 0)),
            pl.BlockSpec(b2.shape, lambda i: (0, 0)),
            pl.BlockSpec(w3.shape, lambda i: (0, 0)),
            pl.BlockSpec(b3.shape, lambda i: (0, 0)),
        ],
        out_specs=pl.BlockSpec((2, tb), lambda i: (0, i)),
        compiler_params=pltpu.CompilerParams(
            dimension_semantics=_dimension_semantics(),
            vmem_limit_bytes=vmem_limit_bytes),
        cost_estimate=pl.CostEstimate(
            flops=flops, transcendentals=0, bytes_accessed=bytes_accessed),
    )(xT, w1, b1, w2, b2, w3, b3)


def qtable_forward(state, params, *, tb=16384, compute_dtype=jnp.bfloat16,
                   vmem_limit_bytes=None):
    """state: (B, 12) float32 -> (B, 2) float32 (same semantics as QtableModel).

    tb: max batch tile (lanes), multiple of 128; clamped to round_up(B, 128).
        Default 16384 fits v5e's 16 MiB default scoped VMEM (~0.5 KB/elem);
        on v6e use 32768+ (raise vmem_limit_bytes beyond 32 MiB if larger),
        keep <= 32768 on v7x (64 MiB VMEM per TensorCore).
    compute_dtype: dtype of matmul operands (bf16 default; f32 for exact
        parity). Accumulation, bias add and LeakyReLU stay in float32.
    """
    B = state.shape[0]
    tb = min(tb, _round_up(B, 128))
    assert tb % 128 == 0, "tb must be a multiple of 128"
    Bp = _round_up(B, tb)

    # Cast first (so the transpose moves narrow data), then transpose + pad in
    # one shot; XLA fuses these into a single pre-kernel pass over x.
    xT = jnp.transpose(state.astype(compute_dtype))  # (12, B)
    if Bp != B:
        xT = jnp.pad(xT, ((0, 0), (0, Bp - B)))

    out_t = _run_mlp(xT, _cast_params(params, compute_dtype), Bp, tb,
                     vmem_limit_bytes)
    # Back to PyTorch layout (B, 2); drop batch padding.
    return jnp.transpose(out_t[:, :B])


def qtable_forward_t(state_t, params, *, tb=16384, compute_dtype=jnp.bfloat16,
                     vmem_limit_bytes=None):
    """Feature-major fast path: state_t (12, B) -> (2, B).

    Skips the wrapper transpose on both sides entirely (use this if the replay
    buffer is stored feature-major, as recommended for large batches).
    """
    B = state_t.shape[1]
    tb = min(tb, _round_up(B, 128))
    assert tb % 128 == 0, "tb must be a multiple of 128"
    Bp = _round_up(B, tb)

    xT = state_t.astype(compute_dtype)
    if Bp != B:
        xT = jnp.pad(xT, ((0, 0), (0, Bp - B)))

    out_t = _run_mlp(xT, _cast_params(params, compute_dtype), Bp, tb,
                     vmem_limit_bytes)
    return out_t[:, :B]


def init_params(key):
    """Deterministic init mimicking torch.nn.Linear (uniform +/- 1/sqrt(fan_in)).

    Weights are (out_features, in_features) — PyTorch's native layout.
    Biases are (out_features, 1) so they broadcast over the lane (batch) axis.
    """
    dims = [(12, 64), (64, 32), (32, 2)]
    params = []
    for fan_in, fan_out in dims:
        kw, kb, key = jax.random.split(key, 3)
        bound = 1.0 / jnp.sqrt(float(fan_in))
        w = jax.random.uniform(kw, (fan_out, fan_in), jnp.float32, -bound, bound)
        b = jax.random.uniform(kb, (fan_out, 1), jnp.float32, -bound, bound)
        params.extend([w, b])
    return tuple(params)


def reference_forward(state, params):
    """Pure-JAX reference with standard (batch, features) orientation."""
    w1, b1, w2, b2, w3, b3 = params
    h = _leaky_relu(state @ w1.T + b1.T)
    h = _leaky_relu(h @ w2.T + b2.T)
    return h @ w3.T + b3.T


if __name__ == "__main__":
    key = jax.random.PRNGKey(0)
    k_in, k_par = jax.random.split(key)
    params = init_params(k_par)

    # Small batch: single 128-wide tile (tb auto-clamped), exact f32 check.
    state_small = jax.random.normal(k_in, (8, 12), dtype=jnp.float32)
    out_small = qtable_forward(state_small, params, compute_dtype=jnp.float32)
    jax.block_until_ready(out_small)
    ref_small = reference_forward(state_small, params)
    assert out_small.shape == (8, 2)
    assert jnp.allclose(out_small, ref_small, atol=1e-5, rtol=1e-5), "small-batch mismatch"

    # Larger ragged batch: exercises multi-tile pipelined grid + padding.
    state_big = jax.random.normal(jax.random.PRNGKey(1), (1000, 12), dtype=jnp.float32)
    ref_big = reference_forward(state_big, params)

    # f32, small explicit tile -> 4 grid steps (tests the pipelined grid path).
    out_f32 = qtable_forward(state_big, params, tb=256, compute_dtype=jnp.float32)
    # bf16 default path, adaptive tile (clamped to 1024 for B=1000).
    out_bf16 = qtable_forward(state_big, params)
    # Feature-major fast path (no wrapper transposes), bf16 default.
    out_t = qtable_forward_t(jnp.transpose(state_big), params)
    jax.block_until_ready((out_f32, out_bf16, out_t))

    assert out_f32.shape == (1000, 2)
    assert jnp.allclose(out_f32, ref_big, atol=1e-5, rtol=1e-5), "f32 mismatch vs reference"
    assert jnp.allclose(out_bf16, ref_big, atol=5e-2, rtol=5e-2), "bf16 mismatch vs reference"
    assert out_t.shape == (2, 1000)
    assert jnp.allclose(jnp.transpose(out_t), ref_big, atol=5e-2, rtol=5e-2), \
        "feature-major path mismatch vs reference"

    print("KERNEL_OK")
</pallas_src>

<mosaic_0001>
module attributes {stable_mosaic.version = 11 : i64} {
  func.func @qtable_kernel(%arg0: i32, %arg1: memref<12x128xf32, #tpu.memory_space<vmem>>, %arg2: memref<64x12xf32, #tpu.memory_space<vmem>>, %arg3: memref<64x1xf32, #tpu.memory_space<vmem>>, %arg4: memref<32x64xf32, #tpu.memory_space<vmem>>, %arg5: memref<32x1xf32, #tpu.memory_space<vmem>>, %arg6: memref<2x32xf32, #tpu.memory_space<vmem>>, %arg7: memref<2x1xf32, #tpu.memory_space<vmem>>, %arg8: memref<2x128xf32, #tpu.memory_space<vmem>>) attributes {dimension_semantics = [#tpu.dimension_semantics<parallel>], iteration_bounds = array<i64: 1>, scalar_prefetch = 0 : i64, scratch_operands = 0 : i64, tpu.core_type = #tpu.core_type<tc>, window_params = [{transform_indices = @transform_0, window_bounds = array<i64: 12, 128>}, {pipeline_mode = #tpu.pipeline_mode<synchronous>, transform_indices = @transform_1, window_bounds = array<i64: 64, 12>}, {pipeline_mode = #tpu.pipeline_mode<synchronous>, transform_indices = @transform_2, window_bounds = array<i64: 64, 1>}, {pipeline_mode = #tpu.pipeline_mode<synchronous>, transform_indices = @transform_3, window_bounds = array<i64: 32, 64>}, {pipeline_mode = #tpu.pipeline_mode<synchronous>, transform_indices = @transform_4, window_bounds = array<i64: 32, 1>}, {pipeline_mode = #tpu.pipeline_mode<synchronous>, transform_indices = @transform_5, window_bounds = array<i64: 2, 32>}, {pipeline_mode = #tpu.pipeline_mode<synchronous>, transform_indices = @transform_6, window_bounds = array<i64: 2, 1>}, {transform_indices = @transform_7, window_bounds = array<i64: 2, 128>}]} {
    %c0 = arith.constant 0 : index
    %c0_0 = arith.constant 0 : index
    %0 = vector.load %arg1[%c0, %c0_0] : memref<12x128xf32, #tpu.memory_space<vmem>>, vector<12x128xf32>
    %c0_1 = arith.constant 0 : index
    %c0_2 = arith.constant 0 : index
    %1 = vector.load %arg2[%c0_1, %c0_2] : memref<64x12xf32, #tpu.memory_space<vmem>>, vector<64x12xf32>
    %cst = arith.constant dense<0.000000e+00> : vector<64x128xf32>
    %2 = tpu.matmul %1, %0, %cst {dimension_numbers = #tpu.dot_dimension_numbers<[1], [0], [0], [1], [0, 0, 1, 1], [], []>} : vector<64x12xf32>, vector<12x128xf32>, vector<64x128xf32> -> vector<64x128xf32>
    %c0_3 = arith.constant 0 : index
    %c0_4 = arith.constant 0 : index
    %3 = vector.load %arg3[%c0_3, %c0_4] : memref<64x1xf32, #tpu.memory_space<vmem>>, vector<64x1xf32>
    %4 = vector.broadcast %3 : vector<64x1xf32> to vector<64x128xf32>
    %5 = arith.addf %2, %4 : vector<64x128xf32>
    %cst_5 = arith.constant 0.000000e+00 : f32
    %6 = vector.broadcast %cst_5 : f32 to vector<64x128xf32>
    %7 = arith.cmpf oge, %5, %6 : vector<64x128xf32>
    %cst_6 = arith.constant 0.00999999977 : f32
    %8 = vector.broadcast %cst_6 : f32 to vector<64x128xf32>
    %9 = arith.mulf %8, %5 : vector<64x128xf32>
    %10 = arith.select %7, %5, %9 : vector<64x128xi1>, vector<64x128xf32>
    %c0_7 = arith.constant 0 : index
    %c0_8 = arith.constant 0 : index
    %11 = vector.load %arg4[%c0_7, %c0_8] : memref<32x64xf32, #tpu.memory_space<vmem>>, vector<32x64xf32>
    %cst_9 = arith.constant dense<0.000000e+00> : vector<32x128xf32>
    %12 = tpu.matmul %11, %10, %cst_9 {dimension_numbers = #tpu.dot_dimension_numbers<[1], [0], [0], [1], [0, 0, 1, 1], [], []>} : vector<32x64xf32>, vector<64x128xf32>, vector<32x128xf32> -> vector<32x128xf32>
    %c0_10 = arith.constant 0 : index
    %c0_11 = arith.constant 0 : index
    %13 = vector.load %arg5[%c0_10, %c0_11] : memref<32x1xf32, #tpu.memory_space<vmem>>, vector<32x1xf32>
    %14 = vector.broadcast %13 : vector<32x1xf32> to vector<32x128xf32>
    %15 = arith.addf %12, %14 : vector<32x128xf32>
    %cst_12 = arith.constant 0.000000e+00 : f32
    %16 = vector.broadcast %cst_12 : f32 to vector<32x128xf32>
    %17 = arith.cmpf oge, %15, %16 : vector<32x128xf32>
    %cst_13 = arith.constant 0.00999999977 : f32
    %18 = vector.broadcast %cst_13 : f32 to vector<32x128xf32>
    %19 = arith.mulf %18, %15 : vector<32x128xf32>
    %20 = arith.select %17, %15, %19 : vector<32x128xi1>, vector<32x128xf32>
    %c0_14 = arith.constant 0 : index
    %c0_15 = arith.constant 0 : index
    %21 = vector.load %arg6[%c0_14, %c0_15] : memref<2x32xf32, #tpu.memory_space<vmem>>, vector<2x32xf32>
    %cst_16 = arith.constant dense<0.000000e+00> : vector<2x128xf32>
    %22 = tpu.matmul %21, %20, %cst_16 {dimension_numbers = #tpu.dot_dimension_numbers<[1], [0], [0], [1], [0, 0, 1, 1], [], []>} : vector<2x32xf32>, vector<32x128xf32>, vector<2x128xf32> -> vector<2x128xf32>
    %c0_17 = arith.constant 0 : index
    %c0_18 = arith.constant 0 : index
    %23 = vector.load %arg7[%c0_17, %c0_18] : memref<2x1xf32, #tpu.memory_space<vmem>>, vector<2x1xf32>
    %24 = vector.broadcast %23 : vector<2x1xf32> to vector<2x128xf32>
    %25 = arith.addf %22, %24 : vector<2x128xf32>
    %c0_19 = arith.constant 0 : index
    %c0_20 = arith.constant 0 : index
    %26 = vector.load %arg8[%c0_19, %c0_20] : memref<2x128xf32, #tpu.memory_space<vmem>>, vector<2x128xf32>
    tpu.vector_store %arg8[%c0_19, %c0_20], %25 {strides = array<i32>} : memref<2x128xf32, #tpu.memory_space<vmem>>, vector<2x128xf32>,
    return
  }
  func.func @transform_0(%arg0: i32) -> (i32, i32) {
    %c0_i32 = arith.constant 0 : i32
    %c0_i32_0 = arith.constant 0 : i32
    return %c0_i32, %arg0 : i32, i32
  }
  func.func @transform_1(%arg0: i32) -> (i32, i32) {
    %c0_i32 = arith.constant 0 : i32
    %c0_i32_0 = arith.constant 0 : i32
    %c0_i32_1 = arith.constant 0 : i32
    return %c0_i32, %c0_i32_0 : i32, i32
  }
  func.func @transform_2(%arg0: i32) -> (i32, i32) {
    %c0_i32 = arith.constant 0 : i32
    %c0_i32_0 = arith.constant 0 : i32
    %c0_i32_1 = arith.constant 0 : i32
    return %c0_i32, %c0_i32_0 : i32, i32
  }
  func.func @transform_3(%arg0: i32) -> (i32, i32) {
    %c0_i32 = arith.constant 0 : i32
    %c0_i32_0 = arith.constant 0 : i32
    %c0_i32_1 = arith.constant 0 : i32
    return %c0_i32, %c0_i32_0 : i32, i32
  }
  func.func @transform_4(%arg0: i32) -> (i32, i32) {
    %c0_i32 = arith.constant 0 : i32
    %c0_i32_0 = arith.constant 0 : i32
    %c0_i32_1 = arith.constant 0 : i32
    return %c0_i32, %c0_i32_0 : i32, i32
  }
  func.func @transform_5(%arg0: i32) -> (i32, i32) {
    %c0_i32 = arith.constant 0 : i32
    %c0_i32_0 = arith.constant 0 : i32
    %c0_i32_1 = arith.constant 0 : i32
    return %c0_i32, %c0_i32_0 : i32, i32
  }
  func.func @transform_6(%arg0: i32) -> (i32, i32) {
    %c0_i32 = arith.constant 0 : i32
    %c0_i32_0 = arith.constant 0 : i32
    %c0_i32_1 = arith.constant 0 : i32
    return %c0_i32, %c0_i32_0 : i32, i32
  }
  func.func @transform_7(%arg0: i32) -> (i32, i32) {
    %c0_i32 = arith.constant 0 : i32
    %c0_i32_0 = arith.constant 0 : i32
    return %c0_i32, %arg0 : i32, i32
  }
}

</mosaic_0001>

<bundles_post_ra>
// kernel: tpu_custom_call.1
= control target key start
LH: loop header
LB: loop body
LE: loop exit
PB: predicated region body
PF: predicated region fallthrough
CT: control target
= control target key end

     0   :  { %vm110_vm0 = vcmask 1043456   ;;  %vm85_vm1 = vcmask 97280   ;;  %v364_v4 = vmov 0   ;;  %s501_s0 = inlined_call_operand.vmem [shape: f32[12,128], index: 0, kind: input, shape index: {}]   ;;  %s502_s1 = inlined_call_operand.vmem [shape: f32[64,12], index: 1, kind: input, shape index: {}]   ;;  %s503_s2 = inlined_call_operand.vmem [shape: f32[64,1], index: 2, kind: input, shape index: {}]   ;;  %s504_s3 = inlined_call_operand.vmem [shape: f32[32,64], index: 3, kind: input, shape index: {}]   ;;  %s505_s4 = inlined_call_operand.vmem [shape: f32[32,1], index: 4, kind: input, shape index: {}]   ;;  %s506_s5 = inlined_call_operand.vmem [shape: f32[2,32], index: 5, kind: input, shape index: {}]   ;;  %s507_s6 = inlined_call_operand.vmem [shape: f32[2,1], index: 6, kind: input, shape index: {}]   ;;  %s508_s7 = inlined_call_operand.hbm [shape: f32[2,128], index: 7, kind: output, shape index: {}]  }
   0x1   :  { %v28_v0 = vld [vmem:[%s501_s0 + $0x8] sm:$0xf]  ;;  %v27_v1 = vld [vmem:[%s501_s0] sm:$0xff]  ;;  %v44_v3 = vld [vmem:[%s503_s2 + $0x38] sm:$0xff]  ;;  %335 = vset.pattern.permute.xlu0 %v364_v4  ;;  %336 = vset.pattern.permute.xlu1 %v364_v4 }
   0x2   :  { %323 = vmatpush.msk.msra.mxu3 %vm110_vm0, %v28_v0  ;;  %v33_v2 = vld [vmem:[%s502_s1 + $0x20] sm:$0xff]  ;;  %309 = vmatpush.msk.msra.mxu0 %vm110_vm0, %v28_v0  ;;  %v42_v6 = vld [vmem:[%s503_s2 + $0x28] sm:$0xff]  ;;  %v40_v7 = vld [vmem:[%s503_s2 + $0x18] sm:$0xff] }
   0x3   :  { %v29_v5 = vld [vmem:[%s502_s1] sm:$0xff]  ;;  %82 = vperm.xlu0 %335, %v44_v3   ;;  %72 = vperm.xlu1 %336, %v42_v6  }
   0x4   :  { %324 = vmatpush.msra.mxu3 %v27_v1  ;;  %129 = vmatpush.msra.mxu0 %v27_v1 }
   0x5   :  { %314 = vmatmul.msk.f32.vlgmr.msra.gmra.mxu3 %vm85_vm1, %v33_v2  ;;  %310 = vmatmul.msk.f32.vlgmr.msra.gmra.mxu0 %vm85_vm1, %v29_v5 }
   0x6   :  { %337 = vset.pattern.permute.xlu2 %v364_v4 }
   0x7   :  { %62 = vperm.xlu2 %337, %v40_v7  }
   0x8   :  { %12 = vsyncpa [#allocation3], 0  ;;  %v43_v8 = vld [vmem:[%s503_s2 + $0x30] sm:$0xff]  ;;  %v34_v9 = vld [vmem:[%s502_s1 + $0x28] sm:$0xff]  ;;  %vm207_vm10 = vcmask 523264   ;;  %vm268_vm15 = vcmask 261120  }
   0x9   :  { %v30_v10 = vld [vmem:[%s502_s1 + $0x8] sm:$0xff]  ;;  %v41_v11 = vld [vmem:[%s503_s2 + $0x20] sm:$0xff]  ;;  %v39_v12 = vld [vmem:[%s503_s2 + $0x10] sm:$0xff]  ;;  %s365_s27 = smov [#allocation2]   ;;  %s300_s8 = sshll.u32 %s508_s7, 4  ;;  %s301_s8 = int_to_ptr.hbm [resolvable:$true] %s300_s8 }
   0xa   :  { %v38_v13 = vld [vmem:[%s503_s2 + $0x8] sm:$0xff]  ;;  %v35_v14 = vld [vmem:[%s502_s1 + $0x30] sm:$0xff]  ;;  %v37_v16 = vld [vmem:[%s503_s2] sm:$0xff]  ;;  %s298_s28 = sshll.u32 %s365_s27, 4  ;;  %s299_s28 = int_to_ptr.vmem [resolvable:$true] %s298_s28 }
   0xb   :  { %77 = vperm.xlu0 %335, %v43_v8   ;;  %67 = vperm.xlu1 %336, %v41_v11   ;;  %v31_v15 = vld [vmem:[%s502_s1 + $0x10] sm:$0xff]  ;;  %v186_v17 = vld [vmem:[%s505_s4 + $0x18] sm:$0xff]  ;;  %v184_v21 = vld [vmem:[%s505_s4 + $0x8] sm:$0xff] }
   0xc   :  { %v185_v18 = vld [vmem:[%s505_s4 + $0x10] sm:$0xff]  ;;  %v36_v19 = vld [vmem:[%s502_s1 + $0x38] sm:$0xff]  ;;  %v183_v22 = vld [vmem:[%s505_s4] sm:$0xff] }
   0xd   :  { %315 = vmatmul.msk.f32.gmra.mxu3 %vm85_vm1, %v34_v9  ;;  %311 = vmatmul.msk.f32.gmra.mxu0 %vm85_vm1, %v30_v10  ;;  %v32_v20 = vld [vmem:[%s502_s1 + $0x18] sm:$0xff]  ;;  %v262_v23 = vld [vmem:[%s507_s6] sm:$0x3]  ;;  %v180_v2 = vld [vmem:[%s504_s3 + $0x8] sm:$0xff] }
   0xe   :  { %v179_v63 = vld [vmem:[%s504_s3] sm:$0xff]  ;;  %v182_v0 = vld [vmem:[%s504_s3 + $0x18] sm:$0xff]  ;;  %v181_v3 = vld [vmem:[%s504_s3 + $0x10] sm:$0xff] }
   0xf   :  { %57 = vperm.xlu2 %337, %v39_v12  }
  0x13   :  { %52 = vperm.xlu0 %335, %v38_v13   ;;  %47 = vperm.xlu1 %336, %v37_v16  }
  0x15   :  { %316 = vmatmul.msk.f32.gmra.mxu3 %vm85_vm1, %v35_v14  ;;  %312 = vmatmul.msk.f32.gmra.mxu0 %vm85_vm1, %v31_v15 }
  0x17   :  { %204 = vperm.xlu2 %337, %v186_v17  }
  0x1b   :  { %199 = vperm.xlu0 %335, %v185_v18   ;;  %194 = vperm.xlu1 %336, %v184_v21  }
  0x1d   :  { %317 = vmatmul.msk.f32.gmra.mxu3 %vm85_vm1, %v36_v19  ;;  %313 = vmatmul.msk.f32.gmra.mxu0 %vm85_vm1, %v32_v20 }
  0x1f   :  { %189 = vperm.xlu2 %337, %v183_v22  }
  0x23   :  { %265 = vperm.xlu0 %335, %v262_v23   ;;  %v261_v23 = vld [vmem:[%s506_s5] sm:$0x3] }
  0x61   :  { %v63_v32 = vpop.permute.xlu2 %62 }
  0x69   :  { %v58_v46 = vpop.permute.xlu2 %57 }
  0x71   :  { %v205_v5 = vpop.permute.xlu2 %204 }
  0x75   :  { %v83_v28 = vpop.permute.xlu0 %82  ;;  %v73_v29 = vpop.permute.xlu1 %72 }
  0x79   :  { %v190_v12 = vpop.permute.xlu2 %189 }
  0x7d   :  { %v78_v33 = vpop.permute.xlu0 %77  ;;  %v68_v34 = vpop.permute.xlu1 %67 }
  0x82   :  { %v131_v24 = vpop.f32.mrf.mxu0 }
  0x85   :  { %v53_v50 = vpop.permute.xlu0 %52  ;;  %v48_v51 = vpop.permute.xlu1 %47 }
  0x86   :  { %v132_v55 = vadd.f32 %v131_v24, %v48_v51 }
  0x88   :  { %v143_v25 = vpop.f32.mrf.mxu3  ;;  %v163_v61 = vmul.f32 0.01, %v132_v55  ;;  %vm155_vm9 = vcmp.ge.f32.partialorder %v132_v55, 0.0 }
  0x89   :  { %v144_v40 = vadd.f32 %v143_v25, %v68_v34 }
  0x8a   :  { %v134_v26 = vpop.f32.mrf.mxu0  ;;  %v171_v1 = vsel %vm155_vm9, %v132_v55, %v163_v61 }
  0x8b   :  { %v167_v49 = vmul.f32 0.01, %v144_v40  ;;  %vm159_vm5 = vcmp.ge.f32.partialorder %v144_v40, 0.0  ;;  %v135_v52 = vadd.f32 %v134_v26, %v53_v50 }
  0x8d   :  { %v175_v56 = vsel %vm159_vm5, %v144_v40, %v167_v49  ;;  %v164_v59 = vmul.f32 0.01, %v135_v52  ;;  %vm156_vm8 = vcmp.ge.f32.partialorder %v135_v52, 0.0  ;;  %v195_v11 = vpop.permute.xlu1 %194  ;;  %v200_v14 = vpop.permute.xlu0 %199 }
  0x8f   :  { %v172_v62 = vsel %vm156_vm8, %v135_v52, %v164_v59 }
  0x90   :  { %v146_v27 = vpop.f32.mrf.mxu3 }
  0x91   :  { %v147_v37 = vadd.f32 %v146_v27, %v73_v29 }
  0x92   :  { %v137_v30 = vpop.f32.mrf.mxu0 }
  0x93   :  { %v168_v45 = vmul.f32 0.01, %v147_v37  ;;  %vm160_vm4 = vcmp.ge.f32.partialorder %v147_v37, 0.0  ;;  %v138_v47 = vadd.f32 %v137_v30, %v58_v46 }
  0x95   :  { %v176_v53 = vsel %vm160_vm4, %v147_v37, %v168_v45  ;;  %v165_v57 = vmul.f32 0.01, %v138_v47  ;;  %vm157_vm7 = vcmp.ge.f32.partialorder %v138_v47, 0.0  ;;  %v266_v25 = vpop.permute.xlu0 %265 }
  0x97   :  { %v173_v60 = vsel %vm157_vm7, %v138_v47, %v165_v57 }
  0x98   :  { %v149_v31 = vpop.f32.mrf.mxu3 }
  0x99   :  { %v150_v35 = vadd.f32 %v149_v31, %v78_v33 }
  0x9a   :  { %v140_v39 = vpop.f32.mrf.mxu0 }
  0x9b   :  { %v169_v42 = vmul.f32 0.01, %v150_v35  ;;  %vm161_vm3 = vcmp.ge.f32.partialorder %v150_v35, 0.0  ;;  %v141_v43 = vadd.f32 %v140_v39, %v63_v32 }
  0x9d   :  { %v177_v48 = vsel %vm161_vm3, %v150_v35, %v169_v42  ;;  %v166_v54 = vmul.f32 0.01, %v141_v43  ;;  %vm158_vm6 = vcmp.ge.f32.partialorder %v141_v43, 0.0 }
  0x9f   :  { %v174_v58 = vsel %vm158_vm6, %v141_v43, %v166_v54 }
  0xa0   :  { %v152_v36 = vpop.f32.mrf.mxu3 }
  0xa1   :  { %v153_v38 = vadd.f32 %v152_v36, %v83_v28 }
  0xa3   :  { %vm162_vm2 = vcmp.ge.f32.partialorder %v153_v38, 0.0  ;;  %v170_v41 = vmul.f32 0.01, %v153_v38 }
  0xa5   :  { %v178_v44 = vsel %vm162_vm2, %v153_v38, %v170_v41 }
  0xa6   :  { %228 = vmatpush.msra.mxu1 %v178_v44  ;;  %325 = vmatpush.msra.mxu2 %v178_v44 }
  0xa8   :  { %229 = vmatpush.msra.mxu1 %v177_v48  ;;  %326 = vmatpush.msra.mxu2 %v177_v48 }
  0xaa   :  { %230 = vmatpush.msra.mxu1 %v176_v53  ;;  %327 = vmatpush.msra.mxu2 %v176_v53 }
  0xac   :  { %231 = vmatpush.msra.mxu1 %v175_v56  ;;  %328 = vmatpush.msra.mxu2 %v175_v56 }
  0xae   :  { %232 = vmatpush.msra.mxu1 %v174_v58  ;;  %329 = vmatpush.msra.mxu2 %v174_v58 }
  0xb0   :  { %233 = vmatpush.msra.mxu1 %v173_v60  ;;  %330 = vmatpush.msra.mxu2 %v173_v60 }
  0xb2   :  { %234 = vmatpush.msra.mxu1 %v172_v62  ;;  %331 = vmatpush.msra.mxu2 %v172_v62 }
  0xb4   :  { %235 = vmatpush.msra.mxu1 %v171_v1  ;;  %332 = vmatpush.msra.mxu2 %v171_v1 }
  0xb5   :  { %318 = vmatmul.msk.f32.vlgmr.msra.gmra.mxu1 %vm207_vm10, %v179_v63  ;;  %321 = vmatmul.msk.f32.vlgmr.msra.gmra.mxu2 %vm207_vm10, %v182_v0 }
  0xbd   :  { %319 = vmatmul.msk.f32.gmra.mxu1 %vm207_vm10, %v180_v2 }
  0xc5   :  { %320 = vmatmul.msk.f32.gmra.mxu1 %vm207_vm10, %v181_v3 }
 0x132   :  { %v237_v4 = vpop.f32.mrf.mxu1 }
 0x133   :  { %v238_v16 = vadd.f32 %v237_v4, %v190_v12 }
 0x135   :  { %v253_v21 = vmul.f32 0.01, %v238_v16  ;;  %vm249_vm14 = vcmp.ge.f32.partialorder %v238_v16, 0.0 }
 0x137   :  { %v257_v24 = vsel %vm249_vm14, %v238_v16, %v253_v21 }
 0x138   :  { %v246_v6 = vpop.f32.mrf.mxu2 }
 0x139   :  { %v247_v7 = vadd.f32 %v246_v6, %v205_v5 }
 0x13a   :  { %v240_v8 = vpop.f32.mrf.mxu1 }
 0x13b   :  { %vm252_vm11 = vcmp.ge.f32.partialorder %v247_v7, 0.0  ;;  %v256_v9 = vmul.f32 0.01, %v247_v7  ;;  %v241_v13 = vadd.f32 %v240_v8, %v195_v11 }
 0x13d   :  { %v260_v10 = vsel %vm252_vm11, %v247_v7, %v256_v9  ;;  %v254_v19 = vmul.f32 0.01, %v241_v13  ;;  %vm250_vm13 = vcmp.ge.f32.partialorder %v241_v13, 0.0 }
 0x13e   :  { %284 = vmatpush.msrb.mxu2 %v260_v10 }
 0x13f   :  { %v258_v22 = vsel %vm250_vm13, %v241_v13, %v254_v19 }
 0x142   :  { %v243_v15 = vpop.f32.mrf.mxu1 }
 0x143   :  { %v244_v17 = vadd.f32 %v243_v15, %v200_v14 }
 0x145   :  { %vm251_vm12 = vcmp.ge.f32.partialorder %v244_v17, 0.0  ;;  %v255_v18 = vmul.f32 0.01, %v244_v17 }
 0x147   :  { %v259_v20 = vsel %vm251_vm12, %v244_v17, %v255_v18 }
 0x148   :  { %285 = vmatpush.msrb.mxu2 %v259_v20 }
 0x14a   :  { %286 = vmatpush.msrb.mxu2 %v258_v22 }
 0x14c   :  { %287 = vmatpush.msrb.mxu2 %v257_v24 }
 0x14d   :  { %322 = vmatmul.msk.f32.vlgmr.msrb.gmra.mxu2 %vm268_vm15, %v261_v23 }
 0x1d0   :  { %v289_v26 = vpop.f32.mrf.mxu2 }
 0x1d1   :  { %v290_v27 = vadd.f32 %v289_v26, %v266_v25 }
 0x1d3   :  { %292 = vst [vmem:[#allocation2] sm:$0x3] %v290_v27 }
 0x1d4   :  { %303 = dma.vmem_to_hbm [thread:$0]  %s299_s28, 32, %s301_s8, [#allocation3]  }
 0x1d5   :  { %362 = dma.done.wait [#allocation3], 32  }
 0x1d6   :  { %363 = vsyncadd [#allocation3], 4294967264 }
 0x1d7   :  { %308 = vsyncpa [#allocation3], 1 }

</bundles_post_ra>
